<compile_context>
chip_gen: v6e
topology: v6e:2x2x1
jax: 0.10.0
libtpu: 0.0.40
codegen_flags: <defaults>
</compile_context>

<pallas_src>
import jax
import jax.numpy as jnp
from jax.experimental import pallas as pl
from jax.experimental.pallas import tpu as pltpu


_MIB = 1 << 20
# Full-K-resident blocks are only used if their double-buffered footprint fits this
# budget (safe on v5e's 16 MiB default scoped VMEM once we raise vmem_limit_bytes,
# and well inside v7x's 64 MiB physical / 32 MiB scoped VMEM).
_FULL_K_VMEM_BUDGET = 24 * _MIB


def _round_up(x, m):
    return ((x + m - 1) // m) * m


def _pick_row_tile(n):
    """Largest row tile whose padding waste is <= 1/8 of the padded size."""
    for t in (512, 256, 128, 64, 32, 16, 8):
        np_ = _round_up(n, t)
        if np_ - n <= np_ // 8:
            return t, np_
    return 8, _round_up(n, 8)


def _pick_divisor_tile(n, candidates):
    """Largest candidate tile that divides n (n is always a multiple of the last)."""
    for t in candidates:
        if n % t == 0:
            return t
    return candidates[-1]


# ----------------------------- kernels ------------------------------------- #

def _linear_relu_kernel(x_ref, w_ref, b_ref, o_ref):
    # x: (tm, K), w: (K, tn), b: (1, tn); full K resident per block.
    acc = jnp.dot(x_ref[...], w_ref[...], preferred_element_type=jnp.float32)
    o_ref[...] = jnp.maximum(acc + b_ref[...], 0.0).astype(o_ref.dtype)


def _linear_relu_kacc_kernel(x_ref, w_ref, b_ref, o_ref, acc_ref):
    # K is the last ("arbitrary") grid axis; accumulate in f32 VMEM scratch,
    # bias + ReLU + store only on the final K step.
    k = pl.program_id(2)

    @pl.when(k == 0)
    def _():
        acc_ref[...] = jnp.zeros_like(acc_ref)

    acc_ref[...] += jnp.dot(x_ref[...], w_ref[...], preferred_element_type=jnp.float32)

    @pl.when(k == pl.num_programs(2) - 1)
    def _():
        o_ref[...] = jnp.maximum(acc_ref[...] + b_ref[...], 0.0).astype(o_ref.dtype)


# ----------------------------- wrapper -------------------------------------- #

def prepare_params(weight_t, bias, *, use_bf16=False):
    """Pad (and optionally cast) the static fc1 parameters ONCE, outside the
    per-call forward.  weight_t = nn.Linear weight transposed, shape (D, H).

    Returns (w_pad, b_pad): w_pad is (Dp, Hp) lane-dense zero-padded (bf16 if
    use_bf16, halving HBM traffic for the streamed operand), b_pad is (1, Hp) f32.
    """
    d, h = weight_t.shape
    dp = _round_up(d, 128)
    hp = _round_up(h, 128)
    w_pad = jnp.pad(weight_t, ((0, dp - d), (0, hp - h)))
    if use_bf16:
        w_pad = w_pad.astype(jnp.bfloat16)   # opt-in; accumulation/bias stay f32
    b_pad = jnp.pad(bias.astype(jnp.float32).reshape(1, h), ((0, 0), (0, hp - h)))
    return w_pad, b_pad


def standard_base_forward(obs, w_pad, b_pad, hidden_dim, *, out_dtype=None):
    """relu(obs @ W^T + b) with parameters pre-padded by prepare_params()."""
    nb, d = obs.shape
    dp, hp = w_pad.shape
    assert d <= dp and hidden_dim <= hp
    out_dtype = out_dtype if out_dtype is not None else obs.dtype

    x_dtype = w_pad.dtype                       # keep both MXU operands the same dtype
    xb = jnp.dtype(x_dtype).itemsize
    ob = jnp.dtype(out_dtype).itemsize

    def pad_x(rows):
        x = obs.astype(x_dtype)
        if rows != nb or dp != d:
            x = jnp.pad(x, ((0, rows - nb), (0, dp - d)))
        return x

    # ---- Tiny path: whole arrays VMEM-resident, single grid-less call. ----
    # TODO(synk): below a few K MACs, dispatching to plain XLA (jnp.maximum(x@w+b,0))
    # avoids the pallas_call launch + pad/slice fixed overhead entirely.
    if nb <= 256 and hp <= 256 and dp <= 512:
        bp = _round_up(nb, 8)
        out_p = pl.pallas_call(
            _linear_relu_kernel,
            out_shape=jax.ShapeDtypeStruct((bp, hp), out_dtype),
            in_specs=[pl.BlockSpec(memory_space=pltpu.MemorySpace.VMEM)] * 3,
            out_specs=pl.BlockSpec(memory_space=pltpu.MemorySpace.VMEM),
        )(pad_x(bp), w_pad, b_pad)
        return out_p[:nb, :hidden_dim]

    tm, bp = _pick_row_tile(nb)
    tn = _pick_divisor_tile(hp, (512, 256, 128))
    n_i, n_j = bp // tm, hp // tn
    x = pad_x(bp)
    flops = 2 * bp * dp * hp

    full_k_vmem = 2 * ((tm * dp + dp * tn) * xb + tn * 4 + tm * tn * ob)

    if full_k_vmem <= _FULL_K_VMEM_BUDGET:
        # ---- 2D grid, full K resident per block. ----
        # Put the operand that is cheaper to re-stream on the innermost axis; the
        # other operand's block index is constant along that axis, so Pallas skips
        # its DMA and it stays VMEM-resident across the inner sweep.
        x_bytes = bp * dp * xb
        w_bytes = dp * hp * xb
        weight_resident = (n_j * x_bytes + w_bytes) <= (n_i * w_bytes + x_bytes)
        if weight_resident:
            grid = (n_j, n_i)          # i innermost -> weight (depends on j only) resident
            x_spec = pl.BlockSpec((tm, dp), lambda j, i: (i, 0))
            w_spec = pl.BlockSpec((dp, tn), lambda j, i: (0, j))
            b_spec = pl.BlockSpec((1, tn), lambda j, i: (0, j))
            o_spec = pl.BlockSpec((tm, tn), lambda j, i: (i, j))
            bytes_accessed = n_j * x_bytes + w_bytes + bp * hp * ob
        else:
            grid = (n_i, n_j)          # j innermost -> x (depends on i only) resident
            x_spec = pl.BlockSpec((tm, dp), lambda i, j: (i, 0))
            w_spec = pl.BlockSpec((dp, tn), lambda i, j: (0, j))
            b_spec = pl.BlockSpec((1, tn), lambda i, j: (0, j))
            o_spec = pl.BlockSpec((tm, tn), lambda i, j: (i, j))
            bytes_accessed = n_i * w_bytes + x_bytes + bp * hp * ob

        out_p = pl.pallas_call(
            _linear_relu_kernel,
            out_shape=jax.ShapeDtypeStruct((bp, hp), out_dtype),
            grid=grid,
            in_specs=[x_spec, w_spec, b_spec],
            out_specs=o_spec,
            compiler_params=pltpu.CompilerParams(
                dimension_semantics=("parallel", "parallel"),
                vmem_limit_bytes=int(min(max(2 * full_k_vmem, 32 * _MIB), 56 * _MIB)),
            ),
            cost_estimate=pl.CostEstimate(
                flops=flops, transcendentals=0, bytes_accessed=int(bytes_accessed)),
        )(x, w_pad, b_pad)
        return out_p[:nb, :hidden_dim]

    # ---- Large K: 3D grid with K as last ("arbitrary") axis + f32 accumulator. ----
    # VMEM use becomes independent of D (needed for v7x 32 MiB scoped / v5e 16 MiB default).
    tk = _pick_divisor_tile(dp, (1024, 512, 256, 128))
    n_k = dp // tk
    kacc_vmem = 2 * ((tm * tk + tk * tn) * xb + tn * 4 + tm * tn * ob) + tm * tn * 4
    bytes_accessed = n_j * bp * dp * xb + n_i * dp * hp * xb + bp * hp * ob
    out_p = pl.pallas_call(
        _linear_relu_kacc_kernel,
        out_shape=jax.ShapeDtypeStruct((bp, hp), out_dtype),
        grid=(n_i, n_j, n_k),
        in_specs=[
            pl.BlockSpec((tm, tk), lambda i, j, k: (i, k)),
            pl.BlockSpec((tk, tn), lambda i, j, k: (k, j)),
            pl.BlockSpec((1, tn), lambda i, j, k: (0, j)),
        ],
        out_specs=pl.BlockSpec((tm, tn), lambda i, j, k: (i, j)),
        scratch_shapes=[pltpu.VMEM((tm, tn), jnp.float32)],
        compiler_params=pltpu.CompilerParams(
            dimension_semantics=("parallel", "parallel", "arbitrary"),
            vmem_limit_bytes=int(min(max(2 * kacc_vmem, 32 * _MIB), 56 * _MIB)),
        ),
        cost_estimate=pl.CostEstimate(
            flops=flops, transcendentals=0, bytes_accessed=int(bytes_accessed)),
    )(x, w_pad, b_pad)
    return out_p[:nb, :hidden_dim]


def reference_forward(obs, weight_t, bias):
    return jnp.maximum(obs @ weight_t + bias, 0.0)


if __name__ == "__main__":
    # --- Small shapes implied by the module: input_shape=32, rnn_hidden_dim=32, batch=8 ---
    batch, input_shape, hidden = 8, 32, 32
    key = jax.random.PRNGKey(0)
    k_obs, k_w, k_b = jax.random.split(key, 3)

    obs = jax.random.normal(k_obs, (batch, input_shape), dtype=jnp.float32)
    # Synthetic params matching nn.Linear shapes: weight (hidden, input_shape), bias (hidden,)
    weight = jax.random.uniform(k_w, (hidden, input_shape), jnp.float32, -0.1, 0.1)
    bias = jax.random.uniform(k_b, (hidden,), jnp.float32, -0.1, 0.1)
    weight_t = weight.T                                    # (input_shape, hidden)

    w_pad, b_pad = prepare_params(weight_t, bias)          # done once, outside the forward
    out = jax.block_until_ready(standard_base_forward(obs, w_pad, b_pad, hidden))
    ref = reference_forward(obs, weight_t, bias)
    assert out.shape == (batch, hidden)
    assert jnp.allclose(out, ref, atol=1e-2, rtol=1e-2), "small-path mismatch vs reference"

    # --- Tiled 2D path (resident-operand grid order, adaptive TM), bf16 weights opt-in ---
    B2, D2, H2 = 512, 160, 384
    k1, k2, k3 = jax.random.split(jax.random.PRNGKey(1), 3)
    obs2 = jax.random.normal(k1, (B2, D2), dtype=jnp.float32)
    w2 = jax.random.uniform(k2, (D2, H2), jnp.float32, -0.05, 0.05)
    b2 = jax.random.uniform(k3, (H2,), jnp.float32, -0.05, 0.05)
    w2p, b2p = prepare_params(w2, b2, use_bf16=True)
    out2 = jax.block_until_ready(standard_base_forward(obs2, w2p, b2p, H2))
    ref2 = reference_forward(obs2, w2, b2)
    assert out2.shape == (B2, H2)
    assert jnp.allclose(out2, ref2, atol=2e-2, rtol=2e-2), "tiled-path mismatch vs reference"

    # --- Large-K path (3D grid, K='arbitrary', f32 VMEM accumulator), f32 operands ---
    B3, D3, H3 = 1000, 3200, 512
    k4, k5, k6 = jax.random.split(jax.random.PRNGKey(2), 3)
    obs3 = jax.random.normal(k4, (B3, D3), dtype=jnp.float32)
    w3 = jax.random.uniform(k5, (D3, H3), jnp.float32, -0.02, 0.02)
    b3 = jax.random.uniform(k6, (H3,), jnp.float32, -0.02, 0.02)
    w3p, b3p = prepare_params(w3, b3)
    out3 = jax.block_until_ready(standard_base_forward(obs3, w3p, b3p, H3))
    ref3 = reference_forward(obs3, w3, b3)
    assert out3.shape == (B3, H3)
    assert jnp.allclose(out3, ref3, atol=3e-2, rtol=3e-2), "k-axis-path mismatch vs reference"

    print("KERNEL_OK")
</pallas_src>

<mosaic_0001>
module attributes {stable_mosaic.version = 11 : i64} {
  func.func @_linear_relu_kernel(%arg0: memref<8x128xf32, #tpu.memory_space<vmem>>, %arg1: memref<128x128xf32, #tpu.memory_space<vmem>>, %arg2: memref<1x128xf32, #tpu.memory_space<vmem>>, %arg3: memref<8x128xf32, #tpu.memory_space<vmem>>) attributes {dimension_semantics = [], scalar_prefetch = 0 : i64, scratch_operands = 0 : i64, tpu.core_type = #tpu.core_type<tc>} {
    %c0 = arith.constant 0 : index
    %c0_0 = arith.constant 0 : index
    %0 = vector.load %arg0[%c0, %c0_0] : memref<8x128xf32, #tpu.memory_space<vmem>>, vector<8x128xf32>
    %c0_1 = arith.constant 0 : index
    %c0_2 = arith.constant 0 : index
    %1 = vector.load %arg1[%c0_1, %c0_2] : memref<128x128xf32, #tpu.memory_space<vmem>>, vector<128x128xf32>
    %cst = arith.constant dense<0.000000e+00> : vector<8x128xf32>
    %2 = tpu.matmul %0, %1, %cst {dimension_numbers = #tpu.dot_dimension_numbers<[1], [0], [0], [1], [0, 0, 1, 1], [], []>} : vector<8x128xf32>, vector<128x128xf32>, vector<8x128xf32> -> vector<8x128xf32>
    %c0_3 = arith.constant 0 : index
    %c0_4 = arith.constant 0 : index
    %3 = vector.load %arg2[%c0_3, %c0_4] : memref<1x128xf32, #tpu.memory_space<vmem>>, vector<1x128xf32>
    %4 = vector.broadcast %3 : vector<1x128xf32> to vector<8x128xf32>
    %5 = arith.addf %2, %4 : vector<8x128xf32>
    %cst_5 = arith.constant 0.000000e+00 : f32
    %6 = vector.broadcast %cst_5 : f32 to vector<8x128xf32>
    %7 = arith.maximumf %5, %6 : vector<8x128xf32>
    %c0_6 = arith.constant 0 : index
    %c0_7 = arith.constant 0 : index
    %8 = vector.load %arg3[%c0_6, %c0_7] : memref<8x128xf32, #tpu.memory_space<vmem>>, vector<8x128xf32>
    tpu.vector_store %arg3[%c0_6, %c0_7], %7 {strides = array<i32>} : memref<8x128xf32, #tpu.memory_space<vmem>>, vector<8x128xf32>,
    return
  }
}

</mosaic_0001>

<bundles_post_ra>
// kernel: tpu_custom_call.1
= control target key start
LH: loop header
LB: loop body
LE: loop exit
PB: predicated region body
PF: predicated region fallthrough
CT: control target
= control target key end

     0   :  { %8 = vsyncpa [#allocation3], 0  ;;  %s318_s0 = inlined_call_operand.hbm [shape: f32[8,128], index: 0, kind: input, shape index: {}]   ;;  %s319_s1 = inlined_call_operand.hbm [shape: f32[128,128], index: 1, kind: input, shape index: {}]   ;;  %s320_s2 = inlined_call_operand.vmem [shape: f32[1,128], index: 2, kind: input, shape index: {}]   ;;  %s321_s3 = inlined_call_operand.hbm [shape: f32[8,128], index: 3, kind: output, shape index: {}]  }
   0x1   :  { %9 = vsyncpa [#allocation6], 0 }
   0x2   :  { %10 = vsyncpa [#allocation4], 0  ;;  %s279_s12 = smov [#allocation2]   ;;  %s280_s14 = smov [#allocation5]  }
   0x3   :  { %s17_s13 = sshll.u32 %s279_s12, 4  ;;  %s26_s15 = sshll.u32 %s280_s14, 4  ;;  %s18_s13 = int_to_ptr.vmem [resolvable:$true] %s17_s13  ;;  %s27_s15 = int_to_ptr.vmem [resolvable:$true] %s26_s15 }
   0x4   :  { %s221_s16 = scalar_lea.vmem %s18_s13, 128  ;;  %p226_p1 = scmp.lt.s32.totalorder %s18_s13, %s18_s13 }
   0x5   :  { %p222_p0 = scmp.ne.s32.totalorder %s18_s13, %s221_s16  ;;  %p227_p2 = scmp.lt.s32.totalorder %s221_s16, %s221_s16 }
   0x7   :  { %p228_p3 = por %p227_p2, %p226_p1 }
   0x9   :  { %p229_p4 = pnand %p228_p3, %p222_p0 }
   0xb   :  { %232 = shalt.err (!%p229_p4)
}
   0xc   :  { %20 = dma.hbm_to_vmem [thread:$0]  %s318_s0, 128, %s18_s13, [#allocation3]  }
   0xd   :  { %s241_s19 = scalar_lea.vmem %s27_s15, 2048  ;;  %p246_p6 = scmp.lt.s32.totalorder %s27_s15, %s27_s15 }
   0xe   :  { %p242_p5 = scmp.ne.s32.totalorder %s27_s15, %s241_s19  ;;  %p247_p7 = scmp.lt.s32.totalorder %s241_s19, %s241_s19 }
  0x10   :  { %p248_p8 = por %p247_p7, %p246_p6 }
  0x12   :  { %p249_p9 = pnand %p248_p8, %p242_p5 }
  0x14   :  { %252 = shalt.err (!%p249_p9)
}
  0x15   :  { %s281_s20 = smov 128   ;;  %s282_s21 = smov 8  }
  0x16   :  { %32 = dma.hbm_to_vmem [thread:$0]  %s319_s1, 2048, %s27_s15, [#allocation6], %s281_s20, %s281_s20, %s282_s21  }
  0x17   :  { %273 = dma.done.wait [#allocation3], 128  }
  0x18   :  { %274 = vsyncadd [#allocation3], 4294967168 }
  0x19   :  { %275 = dma.done.wait [#allocation6], 2048  }
  0x1a   :  { %276 = vsyncadd [#allocation6], 4294965248  ;;  %v283_v0 = vmov 0.0   ;;  %vm284_vm0 = vmmov 0   ;;  %v57_v1 = vld [vmem:[#allocation5 + $0x78] sm:$0xff]  ;;  %v56_v2 = vld [vmem:[#allocation5 + $0x70] sm:$0xff] }
  0x1b   :  { %171 = vmatprep.subr.mxu0 %v283_v0  ;;  %203 = vmatprep.mubr.msk.f32.mxu0 %vm284_vm0, %v283_v0  ;;  %v55_v3 = vld [vmem:[#allocation5 + $0x68] sm:$0xff]  ;;  %v54_v4 = vld [vmem:[#allocation5 + $0x60] sm:$0xff]  ;;  %v53_v5 = vld [vmem:[#allocation5 + $0x58] sm:$0xff]  ;;  %s285_s24 = smov [#allocation7]  }
  0x1c   :  { %172 = vmatpush3.msra.mxu0 %v57_v1  ;;  %v52_v6 = vld [vmem:[#allocation5 + $0x50] sm:$0xff]  ;;  %v51_v7 = vld [vmem:[#allocation5 + $0x48] sm:$0xff]  ;;  %v50_v8 = vld [vmem:[#allocation5 + $0x40] sm:$0xff]  ;;  %s143_s25 = sshll.u32 %s285_s24, 4  ;;  %s144_s25 = int_to_ptr.vmem [resolvable:$true] %s143_s25 }
  0x1d   :  { %173 = vmatprep.subr.mxu0 %v283_v0  ;;  %v49_v9 = vld [vmem:[#allocation5 + $0x38] sm:$0xff]  ;;  %v48_v10 = vld [vmem:[#allocation5 + $0x30] sm:$0xff]  ;;  %v47_v11 = vld [vmem:[#allocation5 + $0x28] sm:$0xff]  ;;  %s253_s26 = scalar_lea.vmem %s144_s25, 128  ;;  %p258_p11 = scmp.lt.s32.totalorder %s144_s25, %s144_s25 }
  0x1e   :  { %174 = vmatpush3.msra.mxu0 %v56_v2  ;;  %v46_v12 = vld [vmem:[#allocation5 + $0x20] sm:$0xff]  ;;  %v45_v13 = vld [vmem:[#allocation5 + $0x18] sm:$0xff]  ;;  %v44_v14 = vld [vmem:[#allocation5 + $0x10] sm:$0xff]  ;;  %p254_p10 = scmp.ne.s32.totalorder %s144_s25, %s253_s26  ;;  %p259_p12 = scmp.lt.s32.totalorder %s253_s26, %s253_s26 }
  0x1f   :  { %175 = vmatprep.subr.mxu0 %v283_v0  ;;  %v43_v15 = vld [vmem:[#allocation5 + $0x8] sm:$0xff]  ;;  %v42_v16 = vld [vmem:[#allocation5] sm:$0xff]  ;;  %v41_v17 = vld [vmem:[#allocation2] sm:$0xff] }
  0x20   :  { %176 = vmatpush3.msra.mxu0 %v55_v3  ;;  %v153_v18 = vld [vmem:[%s320_s2] ss:$0 sm:$0xff]  ;;  %p260_p13 = por %p259_p12, %p258_p11 }
  0x21   :  { %177 = vmatprep.subr.mxu0 %v283_v0 }
  0x22   :  { %178 = vmatpush3.msra.mxu0 %v54_v4  ;;  %p261_p0 = pnand %p260_p13, %p254_p10 }
  0x23   :  { %179 = vmatprep.subr.mxu0 %v283_v0 }
  0x24   :  { %180 = vmatpush3.msra.mxu0 %v53_v5 }
  0x25   :  { %181 = vmatprep.subr.mxu0 %v283_v0 }
  0x26   :  { %182 = vmatpush3.msra.mxu0 %v52_v6 }
  0x27   :  { %183 = vmatprep.subr.mxu0 %v283_v0 }
  0x28   :  { %184 = vmatpush3.msra.mxu0 %v51_v7 }
  0x29   :  { %185 = vmatprep.subr.mxu0 %v283_v0 }
  0x2a   :  { %186 = vmatpush3.msra.mxu0 %v50_v8 }
  0x2b   :  { %187 = vmatprep.subr.mxu0 %v283_v0 }
  0x2c   :  { %188 = vmatpush3.msra.mxu0 %v49_v9 }
  0x2d   :  { %189 = vmatprep.subr.mxu0 %v283_v0 }
  0x2e   :  { %190 = vmatpush3.msra.mxu0 %v48_v10 }
  0x2f   :  { %191 = vmatprep.subr.mxu0 %v283_v0 }
  0x30   :  { %192 = vmatpush3.msra.mxu0 %v47_v11 }
  0x31   :  { %193 = vmatprep.subr.mxu0 %v283_v0 }
  0x32   :  { %194 = vmatpush3.msra.mxu0 %v46_v12 }
  0x33   :  { %195 = vmatprep.subr.mxu0 %v283_v0 }
  0x34   :  { %196 = vmatpush3.msra.mxu0 %v45_v13 }
  0x35   :  { %197 = vmatprep.subr.mxu0 %v283_v0 }
  0x36   :  { %198 = vmatpush3.msra.mxu0 %v44_v14 }
  0x37   :  { %199 = vmatprep.subr.mxu0 %v283_v0 }
  0x38   :  { %200 = vmatpush3.msra.mxu0 %v43_v15 }
  0x39   :  { %201 = vmatprep.subr.mxu0 %v283_v0 }
  0x3a   :  { %202 = vmatpush3.msra.mxu0 %v42_v16 }
  0x3b   :  { %204 = vmatmul.mubr.f32.vlgmr.msra.gmra.mxu0 %v41_v17 }
  0xfb   :  { %v131_v19 = vpop.f32.mrf.mxu0 }
  0xfc   :  { %v132_v20 = vadd.f32 %v153_v18, %v131_v19 }
  0xfd   :  { %v205_v21 = vpop.f32.mrf.mxu0 }
  0xfe   :  { %v135_v22 = vmax.f32 %v132_v20, 0.0 }
 0x100   :  { %136 = vst [vmem:[#allocation7] sm:$0xff] %v135_v22 }
 0x101   :  { %264 = shalt.err (!%p261_p0)
}
 0x102   :  { %146 = dma.vmem_to_hbm [thread:$0]  %s144_s25, 128, %s321_s3, [#allocation4]  }
 0x103   :  { %277 = dma.done.wait [#allocation4], 128  }
 0x104   :  { %278 = vsyncadd [#allocation4], 4294967168 }
 0x105   :  { %150 = vsyncpa [#allocation3], 1 }
 0x106   :  { %151 = vsyncpa [#allocation6], 1 }
 0x107   :  { %152 = vsyncpa [#allocation4], 1 }

</bundles_post_ra>
